<compile_context>
chip_gen: v7x
topology: tpu7x:2x2x1
jax: 0.10.0
libtpu: 0.0.40
codegen_flags: <defaults>
</compile_context>

<pallas_src>
import functools

import jax
import jax.numpy as jnp
from jax.experimental import pallas as pl
from jax.experimental.pallas import tpu as pltpu


def _resblock_kernel(x_ref, mask_ref, w1_ref, b1_ref, w2_ref, b2_ref, out_ref,
                     im_ref, mid_ref, *, K, TH, Wp, res_scale):
    """One (batch, row-tile) per grid step.

    x_ref   : (1, 1, Cp, Lin)        flattened, zero-padded canvas tile (bf16)
    mask_ref: (1, 1, N1)             f32 validity mask for the intermediate
    w*_ref  : (Cp, K*K*Cp)           weights, row co / col (dy*K+dx)*Cp+ci (bf16)
    b*_ref  : (Cp, 1)                f32 biases
    out_ref : (1, 1, Cp, N2)         f32 output slab (lane axis = TH*Wp)
    im_ref  : (K*K*Cp, N1)  scratch  im2col stack (reused by both convs)
    mid_ref : (Cp, N1 + 2P) scratch  W-re-padded conv1 output canvas
    """
    P = K // 2
    TM = TH + 2 * P          # intermediate rows (output rows + conv2 halo)
    N1 = TM * Wp             # flattened intermediate slab length
    N2 = TH * Wp             # flattened output slab length
    Cp = out_ref.shape[2]
    cdt = x_ref.dtype
    offs = [dy * Wp + dx for dy in range(K) for dx in range(K)]

    # ---- conv1: im2col (lane-offset slices) + one big-contraction matmul ----
    for t, o in enumerate(offs):
        im_ref[t * Cp:(t + 1) * Cp, :] = x_ref[0, 0, :, o:o + N1]
    mid = jnp.dot(w1_ref[...], im_ref[...], preferred_element_type=jnp.float32)
    mid = jnp.maximum(mid + b1_ref[...], 0.0)                     # (Cp, N1) f32

    # Zero everything that must act as conv2 zero-padding (halo rows outside
    # [0, H), bottom round-up rows, junk columns w >= W), then re-pad by P
    # columns by writing into the (Cp, N1 + 2P) canvas scratch.
    mid = (mid * mask_ref[0]).astype(cdt)
    mid_ref[:, 0:P] = jnp.zeros((Cp, P), cdt)
    mid_ref[:, P + N1:] = jnp.zeros((Cp, P), cdt)
    mid_ref[:, P:P + N1] = mid

    # ---- conv2 over the re-padded intermediate -------------------------------
    for t, o in enumerate(offs):
        im_ref[t * Cp:(t + 1) * Cp, 0:N2] = mid_ref[:, o:o + N2]
    out = jnp.dot(w2_ref[...], im_ref[:, 0:N2],
                  preferred_element_type=jnp.float32)
    out = out + b2_ref[...]                                       # (Cp, N2) f32

    # ---- residual add: interior of x is just another lane-offset slice ------
    roff = 2 * P * Wp + P
    resid = x_ref[0, 0, :, roff:roff + N2].astype(jnp.float32)
    out_ref[0, 0] = out * res_scale + resid


def _pick_tile_h(H, W, Cp, K, itemsize, budget_bytes=8 * 1024 * 1024):
    """Pick a row-tile height from a conservative VMEM budget (v7x-safe)."""
    P = K // 2
    Wp = W + 2 * P
    per_row = Wp * (K * K * Cp * itemsize        # im2col scratch
                    + Cp * itemsize              # mid canvas
                    + 2 * Cp * itemsize          # double-buffered input block
                    + 2 * Cp * 4)                # double-buffered f32 output
    th = max(8, int(budget_bytes // max(per_row, 1)))
    return min(th, H)


def resblock_forward(x_nchw, w1, b1, w2, b2, *, res_scale=1.0, tile_h=None,
                     compute_dtype=jnp.bfloat16):
    """x_nchw: (B, C, H, W); w: (Cout, Cin, K, K); b: (C,).  Returns (B, C, H, W) f32."""
    B, C, H, W = x_nchw.shape
    K = w1.shape[-1]
    assert w1.shape == (C, C, K, K) and w2.shape == (C, C, K, K)
    assert K % 2 == 1, "only odd kernel_size ('same' conv) is supported"
    P = K // 2
    Wp = W + 2 * P
    Cp = -(-C // 8) * 8                    # pad channels to a sublane multiple
    itemsize = jnp.dtype(compute_dtype).itemsize

    if tile_h is None:
        tile_h = _pick_tile_h(H, W, Cp, K, itemsize)
    TH = max(1, min(int(tile_h), H))
    n_t = -(-H // TH)
    Hpad = n_t * TH
    TM = TH + 2 * P
    N1 = TM * Wp
    N2 = TH * Wp
    Lin = (TH + 4 * P) * Wp + 2 * P

    # ---- layout plumbing (cheap XLA, no compute hoisted) ---------------------
    x = x_nchw.astype(jnp.float32)
    # channels -> Cp; H: 2P halo top / 2P halo + tile round-up bottom; W: P each side
    xp = jnp.pad(x, ((0, 0), (0, Cp - C), (2 * P, 2 * P + Hpad - H), (P, P)))
    flat = xp.reshape(B, Cp, (Hpad + 4 * P) * Wp)
    flat = jnp.pad(flat, ((0, 0), (0, 0), (0, 2 * P))).astype(compute_dtype)
    # Pre-tile overlapping halo windows (overlap is not expressible with plain
    # Blocked BlockSpecs); HBM duplication is only 4P rows per TH rows.
    tiles = jnp.stack(
        [flat[:, :, i * TH * Wp:i * TH * Wp + Lin] for i in range(n_t)], axis=1)

    # Per-tile validity mask for the intermediate (keeps iota/div out of the kernel).
    lr = jnp.arange(TM)
    r = jnp.arange(n_t)[:, None] * TH - P + lr[None, :]          # global mid row
    row_ok = (r >= 0) & (r < H)
    col_ok = jnp.arange(Wp) < W
    mask = (row_ok[:, :, None] & col_ok[None, None, :]).astype(jnp.float32)
    mask = mask.reshape(n_t, 1, N1)

    def prep_w(wt):
        wq = jnp.pad(wt.astype(jnp.float32),
                     ((0, Cp - C), (0, Cp - C), (0, 0), (0, 0)))
        # (Cout, Cin, K, K) -> (Cout, K, K, Cin) -> (Cout, K*K*Cin)
        return jnp.transpose(wq, (0, 2, 3, 1)).reshape(Cp, K * K * Cp).astype(compute_dtype)

    def prep_b(bt):
        return jnp.pad(bt.astype(jnp.float32), (0, Cp - C)).reshape(Cp, 1)

    w1m, w2m = prep_w(w1), prep_w(w2)
    b1m, b2m = prep_b(b1), prep_b(b2)

    kernel = functools.partial(_resblock_kernel, K=K, TH=TH, Wp=Wp,
                               res_scale=float(res_scale))

    out = pl.pallas_call(
        kernel,
        out_shape=jax.ShapeDtypeStruct((B, n_t, Cp, N2), jnp.float32),
        grid=(B, n_t),
        in_specs=[
            pl.BlockSpec((1, 1, Cp, Lin), lambda b, i: (b, i, 0, 0)),
            pl.BlockSpec((1, 1, N1), lambda b, i: (i, 0, 0)),
            pl.BlockSpec((Cp, K * K * Cp), lambda b, i: (0, 0)),
            pl.BlockSpec((Cp, 1), lambda b, i: (0, 0)),
            pl.BlockSpec((Cp, K * K * Cp), lambda b, i: (0, 0)),
            pl.BlockSpec((Cp, 1), lambda b, i: (0, 0)),
        ],
        out_specs=pl.BlockSpec((1, 1, Cp, N2), lambda b, i: (b, i, 0, 0)),
        scratch_shapes=[
            pltpu.VMEM((K * K * Cp, N1), compute_dtype),   # im2col stack
            pltpu.VMEM((Cp, N1 + 2 * P), compute_dtype),   # re-padded conv1 out
        ],
        compiler_params=pltpu.CompilerParams(
            dimension_semantics=("parallel", "parallel"),
            vmem_limit_bytes=32 * 1024 * 1024),
    )(tiles, mask, w1m, b1m, w2m, b2m)

    out = out.reshape(B, n_t, Cp, TH, Wp)
    out = jnp.transpose(out, (0, 2, 1, 3, 4)).reshape(B, Cp, Hpad, Wp)
    return out[:, :C, :H, :W]


# ---------------------------- reference (plain JAX) ---------------------------
def _conv_nchw(x, w, b, pad):
    y = jax.lax.conv_general_dilated(
        x, w, window_strides=(1, 1), padding=[(pad, pad), (pad, pad)],
        dimension_numbers=("NCHW", "OIHW", "NCHW"),
        precision=jax.lax.Precision.HIGHEST)
    return y + b.reshape(1, -1, 1, 1)


def resblock_ref(x, w1, b1, w2, b2, res_scale=1.0, compute_dtype=jnp.float32):
    """Reference. compute_dtype=bf16 mirrors the kernel's quantization points."""
    cast = lambda a: a.astype(compute_dtype).astype(jnp.float32)
    p = w1.shape[-1] // 2
    xq = cast(x)
    h = jnp.maximum(_conv_nchw(xq, cast(w1), b1.astype(jnp.float32), p), 0.0)
    r = _conv_nchw(cast(h), cast(w2), b2.astype(jnp.float32), p) * res_scale
    return r + xq


if __name__ == "__main__":
    B, C, H, W, K = 2, 4, 16, 16, 3   # n_feat=4, kernel_size=3
    res_scale = 1.0

    key = jax.random.PRNGKey(0)
    kx, k1, kb1, k2, kb2 = jax.random.split(key, 5)

    # deterministic, PyTorch-like uniform(-bound, bound) init
    bound = 1.0 / (C * K * K) ** 0.5
    x = jax.random.normal(kx, (B, C, H, W), dtype=jnp.float32)
    w1 = jax.random.uniform(k1, (C, C, K, K), jnp.float32, -bound, bound)
    b1 = jax.random.uniform(kb1, (C,), jnp.float32, -bound, bound)
    w2 = jax.random.uniform(k2, (C, C, K, K), jnp.float32, -bound, bound)
    b2 = jax.random.uniform(kb2, (C,), jnp.float32, -bound, bound)

    # tile_h=8 forces 2 row tiles so the halo / tiling path is exercised.
    out = resblock_forward(x, w1, b1, w2, b2, res_scale=res_scale, tile_h=8)
    out = jax.block_until_ready(out)
    assert out.shape == (B, C, H, W)

    # Tight check vs a reference with the same bf16 quantization points.
    ref_q = resblock_ref(x, w1, b1, w2, b2, res_scale, compute_dtype=jnp.bfloat16)
    assert jnp.allclose(out, ref_q, atol=1e-2, rtol=1e-2), "mismatch vs bf16 reference"

    # Loose sanity check vs the pure-f32 module semantics.
    ref_f32 = resblock_ref(x, w1, b1, w2, b2, res_scale)
    assert jnp.allclose(out, ref_f32, atol=1e-1, rtol=1e-1), "mismatch vs f32 reference"

    print("KERNEL_OK")
</pallas_src>

<mosaic_0001>
module attributes {stable_mosaic.version = 11 : i64} {
  func.func @_resblock_kernel(%arg0: i32, %arg1: i32, %arg2: memref<1x1x8x218xbf16, #tpu.memory_space<vmem>>, %arg3: memref<1x1x180xf32, #tpu.memory_space<vmem>>, %arg4: memref<8x72xbf16, #tpu.memory_space<vmem>>, %arg5: memref<8x1xf32, #tpu.memory_space<vmem>>, %arg6: memref<8x72xbf16, #tpu.memory_space<vmem>>, %arg7: memref<8x1xf32, #tpu.memory_space<vmem>>, %arg8: memref<1x1x8x144xf32, #tpu.memory_space<vmem>>, %arg9: memref<72x180xbf16, #tpu.memory_space<vmem>>, %arg10: memref<8x182xbf16, #tpu.memory_space<vmem>>) attributes {dimension_semantics = [#tpu.dimension_semantics<parallel>, #tpu.dimension_semantics<parallel>], iteration_bounds = array<i64: 2, 2>, scalar_prefetch = 0 : i64, scratch_operands = 2 : i64, tpu.core_type = #tpu.core_type<tc>, window_params = [{transform_indices = @transform_0, window_bounds = array<i64: 1, 1, 8, 218>}, {transform_indices = @transform_1, window_bounds = array<i64: 1, 1, 180>}, {pipeline_mode = #tpu.pipeline_mode<synchronous>, transform_indices = @transform_2, window_bounds = array<i64: 8, 72>}, {pipeline_mode = #tpu.pipeline_mode<synchronous>, transform_indices = @transform_3, window_bounds = array<i64: 8, 1>}, {pipeline_mode = #tpu.pipeline_mode<synchronous>, transform_indices = @transform_4, window_bounds = array<i64: 8, 72>}, {pipeline_mode = #tpu.pipeline_mode<synchronous>, transform_indices = @transform_5, window_bounds = array<i64: 8, 1>}, {transform_indices = @transform_6, window_bounds = array<i64: 1, 1, 8, 144>}]} {
    %c0 = arith.constant 0 : index
    %c0_0 = arith.constant 0 : index
    %c0_1 = arith.constant 0 : index
    %c0_2 = arith.constant 0 : index
    %0 = vector.load %arg2[%c0, %c0_0, %c0_1, %c0_2] : memref<1x1x8x218xbf16, #tpu.memory_space<vmem>>, vector<1x1x8x180xbf16>
    %1 = vector.shape_cast %0 : vector<1x1x8x180xbf16> to vector<8x180xbf16>
    %c0_3 = arith.constant 0 : index
    %c0_4 = arith.constant 0 : index
    %2 = vector.load %arg9[%c0_3, %c0_4] : memref<72x180xbf16, #tpu.memory_space<vmem>>, vector<8x180xbf16>
    tpu.vector_store %arg9[%c0_3, %c0_4], %1 {strides = array<i32>} : memref<72x180xbf16, #tpu.memory_space<vmem>>, vector<8x180xbf16>,
    %c0_5 = arith.constant 0 : index
    %c0_6 = arith.constant 0 : index
    %c0_7 = arith.constant 0 : index
    %c1 = arith.constant 1 : index
    %3 = vector.load %arg2[%c0_5, %c0_6, %c0_7, %c1] : memref<1x1x8x218xbf16, #tpu.memory_space<vmem>>, vector<1x1x8x180xbf16>
    %4 = vector.shape_cast %3 : vector<1x1x8x180xbf16> to vector<8x180xbf16>
    %c8 = arith.constant 8 : index
    %c0_8 = arith.constant 0 : index
    %5 = vector.load %arg9[%c8, %c0_8] : memref<72x180xbf16, #tpu.memory_space<vmem>>, vector<8x180xbf16>
    tpu.vector_store %arg9[%c8, %c0_8], %4 {strides = array<i32>} : memref<72x180xbf16, #tpu.memory_space<vmem>>, vector<8x180xbf16>,
    %c0_9 = arith.constant 0 : index
    %c0_10 = arith.constant 0 : index
    %c0_11 = arith.constant 0 : index
    %c2 = arith.constant 2 : index
    %6 = vector.load %arg2[%c0_9, %c0_10, %c0_11, %c2] : memref<1x1x8x218xbf16, #tpu.memory_space<vmem>>, vector<1x1x8x180xbf16>
    %7 = vector.shape_cast %6 : vector<1x1x8x180xbf16> to vector<8x180xbf16>
    %c16 = arith.constant 16 : index
    %c0_12 = arith.constant 0 : index
    %8 = vector.load %arg9[%c16, %c0_12] : memref<72x180xbf16, #tpu.memory_space<vmem>>, vector<8x180xbf16>
    tpu.vector_store %arg9[%c16, %c0_12], %7 {strides = array<i32>} : memref<72x180xbf16, #tpu.memory_space<vmem>>, vector<8x180xbf16>,
    %c0_13 = arith.constant 0 : index
    %c0_14 = arith.constant 0 : index
    %c0_15 = arith.constant 0 : index
    %c18 = arith.constant 18 : index
    %9 = vector.load %arg2[%c0_13, %c0_14, %c0_15, %c18] : memref<1x1x8x218xbf16, #tpu.memory_space<vmem>>, vector<1x1x8x180xbf16>
    %10 = vector.shape_cast %9 : vector<1x1x8x180xbf16> to vector<8x180xbf16>
    %c24 = arith.constant 24 : index
    %c0_16 = arith.constant 0 : index
    %11 = vector.load %arg9[%c24, %c0_16] : memref<72x180xbf16, #tpu.memory_space<vmem>>, vector<8x180xbf16>
    tpu.vector_store %arg9[%c24, %c0_16], %10 {strides = array<i32>} : memref<72x180xbf16, #tpu.memory_space<vmem>>, vector<8x180xbf16>,
    %c0_17 = arith.constant 0 : index
    %c0_18 = arith.constant 0 : index
    %c0_19 = arith.constant 0 : index
    %c19 = arith.constant 19 : index
    %12 = vector.load %arg2[%c0_17, %c0_18, %c0_19, %c19] : memref<1x1x8x218xbf16, #tpu.memory_space<vmem>>, vector<1x1x8x180xbf16>
    %13 = vector.shape_cast %12 : vector<1x1x8x180xbf16> to vector<8x180xbf16>
    %c32 = arith.constant 32 : index
    %c0_20 = arith.constant 0 : index
    %14 = vector.load %arg9[%c32, %c0_20] : memref<72x180xbf16, #tpu.memory_space<vmem>>, vector<8x180xbf16>
    tpu.vector_store %arg9[%c32, %c0_20], %13 {strides = array<i32>} : memref<72x180xbf16, #tpu.memory_space<vmem>>, vector<8x180xbf16>,
    %c0_21 = arith.constant 0 : index
    %c0_22 = arith.constant 0 : index
    %c0_23 = arith.constant 0 : index
    %c20 = arith.constant 20 : index
    %15 = vector.load %arg2[%c0_21, %c0_22, %c0_23, %c20] : memref<1x1x8x218xbf16, #tpu.memory_space<vmem>>, vector<1x1x8x180xbf16>
    %16 = vector.shape_cast %15 : vector<1x1x8x180xbf16> to vector<8x180xbf16>
    %c40 = arith.constant 40 : index
    %c0_24 = arith.constant 0 : index
    %17 = vector.load %arg9[%c40, %c0_24] : memref<72x180xbf16, #tpu.memory_space<vmem>>, vector<8x180xbf16>
    tpu.vector_store %arg9[%c40, %c0_24], %16 {strides = array<i32>} : memref<72x180xbf16, #tpu.memory_space<vmem>>, vector<8x180xbf16>,
    %c0_25 = arith.constant 0 : index
    %c0_26 = arith.constant 0 : index
    %c0_27 = arith.constant 0 : index
    %c36 = arith.constant 36 : index
    %18 = vector.load %arg2[%c0_25, %c0_26, %c0_27, %c36] : memref<1x1x8x218xbf16, #tpu.memory_space<vmem>>, vector<1x1x8x180xbf16>
    %19 = vector.shape_cast %18 : vector<1x1x8x180xbf16> to vector<8x180xbf16>
    %c48 = arith.constant 48 : index
    %c0_28 = arith.constant 0 : index
    %20 = vector.load %arg9[%c48, %c0_28] : memref<72x180xbf16, #tpu.memory_space<vmem>>, vector<8x180xbf16>
    tpu.vector_store %arg9[%c48, %c0_28], %19 {strides = array<i32>} : memref<72x180xbf16, #tpu.memory_space<vmem>>, vector<8x180xbf16>,
    %c0_29 = arith.constant 0 : index
    %c0_30 = arith.constant 0 : index
    %c0_31 = arith.constant 0 : index
    %c37 = arith.constant 37 : index
    %21 = vector.load %arg2[%c0_29, %c0_30, %c0_31, %c37] : memref<1x1x8x218xbf16, #tpu.memory_space<vmem>>, vector<1x1x8x180xbf16>
    %22 = vector.shape_cast %21 : vector<1x1x8x180xbf16> to vector<8x180xbf16>
    %c56 = arith.constant 56 : index
    %c0_32 = arith.constant 0 : index
    %23 = vector.load %arg9[%c56, %c0_32] : memref<72x180xbf16, #tpu.memory_space<vmem>>, vector<8x180xbf16>
    tpu.vector_store %arg9[%c56, %c0_32], %22 {strides = array<i32>} : memref<72x180xbf16, #tpu.memory_space<vmem>>, vector<8x180xbf16>,
    %c0_33 = arith.constant 0 : index
    %c0_34 = arith.constant 0 : index
    %c0_35 = arith.constant 0 : index
    %c38 = arith.constant 38 : index
    %24 = vector.load %arg2[%c0_33, %c0_34, %c0_35, %c38] : memref<1x1x8x218xbf16, #tpu.memory_space<vmem>>, vector<1x1x8x180xbf16>
    %25 = vector.shape_cast %24 : vector<1x1x8x180xbf16> to vector<8x180xbf16>
    %c64 = arith.constant 64 : index
    %c0_36 = arith.constant 0 : index
    %26 = vector.load %arg9[%c64, %c0_36] : memref<72x180xbf16, #tpu.memory_space<vmem>>, vector<8x180xbf16>
    tpu.vector_store %arg9[%c64, %c0_36], %25 {strides = array<i32>} : memref<72x180xbf16, #tpu.memory_space<vmem>>, vector<8x180xbf16>,
    %c0_37 = arith.constant 0 : index
    %c0_38 = arith.constant 0 : index
    %27 = vector.load %arg4[%c0_37, %c0_38] : memref<8x72xbf16, #tpu.memory_space<vmem>>, vector<8x72xbf16>
    %c0_39 = arith.constant 0 : index
    %c0_40 = arith.constant 0 : index
    %28 = vector.load %arg9[%c0_39, %c0_40] : memref<72x180xbf16, #tpu.memory_space<vmem>>, vector<72x180xbf16>
    %cst = arith.constant dense<0.000000e+00> : vector<8x180xf32>
    %29 = tpu.matmul %27, %28, %cst {dimension_numbers = #tpu.dot_dimension_numbers<[1], [0], [0], [1], [0, 0, 1, 1], [], []>} : vector<8x72xbf16>, vector<72x180xbf16>, vector<8x180xf32> -> vector<8x180xf32>
    %c0_41 = arith.constant 0 : index
    %c0_42 = arith.constant 0 : index
    %30 = vector.load %arg5[%c0_41, %c0_42] : memref<8x1xf32, #tpu.memory_space<vmem>>, vector<8x1xf32>
    %31 = vector.broadcast %30 : vector<8x1xf32> to vector<8x180xf32>
    %32 = arith.addf %29, %31 : vector<8x180xf32>
    %cst_43 = arith.constant 0.000000e+00 : f32
    %33 = vector.broadcast %cst_43 : f32 to vector<8x180xf32>
    %34 = arith.maximumf %32, %33 : vector<8x180xf32>
    %c0_44 = arith.constant 0 : index
    %c0_45 = arith.constant 0 : index
    %c0_46 = arith.constant 0 : index
    %35 = vector.load %arg3[%c0_44, %c0_45, %c0_46] : memref<1x1x180xf32, #tpu.memory_space<vmem>>, vector<1x1x180xf32>
    %36 = vector.shape_cast %35 : vector<1x1x180xf32> to vector<1x180xf32>
    %37 = vector.broadcast %36 : vector<1x180xf32> to vector<8x180xf32>
    %38 = arith.mulf %34, %37 : vector<8x180xf32>
    %39 = arith.truncf %38 : vector<8x180xf32> to vector<8x180xbf16>
    %cst_47 = arith.constant 0.000000e+00 : bf16
    %40 = vector.broadcast %cst_47 : bf16 to vector<8x1xbf16>
    %c0_48 = arith.constant 0 : index
    %c0_49 = arith.constant 0 : index
    %41 = vector.load %arg10[%c0_48, %c0_49] : memref<8x182xbf16, #tpu.memory_space<vmem>>, vector<8x1xbf16>
    tpu.vector_store %arg10[%c0_48, %c0_49], %40 {strides = array<i32>} : memref<8x182xbf16, #tpu.memory_space<vmem>>, vector<8x1xbf16>,
    %cst_50 = arith.constant 0.000000e+00 : bf16
    %42 = vector.broadcast %cst_50 : bf16 to vector<8x1xbf16>
    %c0_51 = arith.constant 0 : index
    %c181 = arith.constant 181 : index
    %43 = vector.load %arg10[%c0_51, %c181] : memref<8x182xbf16, #tpu.memory_space<vmem>>, vector<8x1xbf16>
    tpu.vector_store %arg10[%c0_51, %c181], %42 {strides = array<i32>} : memref<8x182xbf16, #tpu.memory_space<vmem>>, vector<8x1xbf16>,
    %c0_52 = arith.constant 0 : index
    %c1_53 = arith.constant 1 : index
    %44 = vector.load %arg10[%c0_52, %c1_53] : memref<8x182xbf16, #tpu.memory_space<vmem>>, vector<8x180xbf16>
    tpu.vector_store %arg10[%c0_52, %c1_53], %39 {strides = array<i32>} : memref<8x182xbf16, #tpu.memory_space<vmem>>, vector<8x180xbf16>,
    %c0_54 = arith.constant 0 : index
    %c0_55 = arith.constant 0 : index
    %45 = vector.load %arg10[%c0_54, %c0_55] : memref<8x182xbf16, #tpu.memory_space<vmem>>, vector<8x144xbf16>
    %c0_56 = arith.constant 0 : index
    %c0_57 = arith.constant 0 : index
    %46 = vector.load %arg9[%c0_56, %c0_57] : memref<72x180xbf16, #tpu.memory_space<vmem>>, vector<8x144xbf16>
    tpu.vector_store %arg9[%c0_56, %c0_57], %45 {strides = array<i32>} : memref<72x180xbf16, #tpu.memory_space<vmem>>, vector<8x144xbf16>,
    %c0_58 = arith.constant 0 : index
    %c1_59 = arith.constant 1 : index
    %47 = vector.load %arg10[%c0_58, %c1_59] : memref<8x182xbf16, #tpu.memory_space<vmem>>, vector<8x144xbf16>
    %c8_60 = arith.constant 8 : index
    %c0_61 = arith.constant 0 : index
    %48 = vector.load %arg9[%c8_60, %c0_61] : memref<72x180xbf16, #tpu.memory_space<vmem>>, vector<8x144xbf16>
    tpu.vector_store %arg9[%c8_60, %c0_61], %47 {strides = array<i32>} : memref<72x180xbf16, #tpu.memory_space<vmem>>, vector<8x144xbf16>,
    %c0_62 = arith.constant 0 : index
    %c2_63 = arith.constant 2 : index
    %49 = vector.load %arg10[%c0_62, %c2_63] : memref<8x182xbf16, #tpu.memory_space<vmem>>, vector<8x144xbf16>
    %c16_64 = arith.constant 16 : index
    %c0_65 = arith.constant 0 : index
    %50 = vector.load %arg9[%c16_64, %c0_65] : memref<72x180xbf16, #tpu.memory_space<vmem>>, vector<8x144xbf16>
    tpu.vector_store %arg9[%c16_64, %c0_65], %49 {strides = array<i32>} : memref<72x180xbf16, #tpu.memory_space<vmem>>, vector<8x144xbf16>,
    %c0_66 = arith.constant 0 : index
    %c18_67 = arith.constant 18 : index
    %51 = vector.load %arg10[%c0_66, %c18_67] : memref<8x182xbf16, #tpu.memory_space<vmem>>, vector<8x144xbf16>
    %c24_68 = arith.constant 24 : index
    %c0_69 = arith.constant 0 : index
    %52 = vector.load %arg9[%c24_68, %c0_69] : memref<72x180xbf16, #tpu.memory_space<vmem>>, vector<8x144xbf16>
    tpu.vector_store %arg9[%c24_68, %c0_69], %51 {strides = array<i32>} : memref<72x180xbf16, #tpu.memory_space<vmem>>, vector<8x144xbf16>,
    %c0_70 = arith.constant 0 : index
    %c19_71 = arith.constant 19 : index
    %53 = vector.load %arg10[%c0_70, %c19_71] : memref<8x182xbf16, #tpu.memory_space<vmem>>, vector<8x144xbf16>
    %c32_72 = arith.constant 32 : index
    %c0_73 = arith.constant 0 : index
    %54 = vector.load %arg9[%c32_72, %c0_73] : memref<72x180xbf16, #tpu.memory_space<vmem>>, vector<8x144xbf16>
    tpu.vector_store %arg9[%c32_72, %c0_73], %53 {strides = array<i32>} : memref<72x180xbf16, #tpu.memory_space<vmem>>, vector<8x144xbf16>,
    %c0_74 = arith.constant 0 : index
    %c20_75 = arith.constant 20 : index
    %55 = vector.load %arg10[%c0_74, %c20_75] : memref<8x182xbf16, #tpu.memory_space<vmem>>, vector<8x144xbf16>
    %c40_76 = arith.constant 40 : index
    %c0_77 = arith.constant 0 : index
    %56 = vector.load %arg9[%c40_76, %c0_77] : memref<72x180xbf16, #tpu.memory_space<vmem>>, vector<8x144xbf16>
    tpu.vector_store %arg9[%c40_76, %c0_77], %55 {strides = array<i32>} : memref<72x180xbf16, #tpu.memory_space<vmem>>, vector<8x144xbf16>,
    %c0_78 = arith.constant 0 : index
    %c36_79 = arith.constant 36 : index
    %57 = vector.load %arg10[%c0_78, %c36_79] : memref<8x182xbf16, #tpu.memory_space<vmem>>, vector<8x144xbf16>
    %c48_80 = arith.constant 48 : index
    %c0_81 = arith.constant 0 : index
    %58 = vector.load %arg9[%c48_80, %c0_81] : memref<72x180xbf16, #tpu.memory_space<vmem>>, vector<8x144xbf16>
    tpu.vector_store %arg9[%c48_80, %c0_81], %57 {strides = array<i32>} : memref<72x180xbf16, #tpu.memory_space<vmem>>, vector<8x144xbf16>,
    %c0_82 = arith.constant 0 : index
    %c37_83 = arith.constant 37 : index
    %59 = vector.load %arg10[%c0_82, %c37_83] : memref<8x182xbf16, #tpu.memory_space<vmem>>, vector<8x144xbf16>
    %c56_84 = arith.constant 56 : index
    %c0_85 = arith.constant 0 : index
    %60 = vector.load %arg9[%c56_84, %c0_85] : memref<72x180xbf16, #tpu.memory_space<vmem>>, vector<8x144xbf16>
    tpu.vector_store %arg9[%c56_84, %c0_85], %59 {strides = array<i32>} : memref<72x180xbf16, #tpu.memory_space<vmem>>, vector<8x144xbf16>,
    %c0_86 = arith.constant 0 : index
    %c38_87 = arith.constant 38 : index
    %61 = vector.load %arg10[%c0_86, %c38_87] : memref<8x182xbf16, #tpu.memory_space<vmem>>, vector<8x144xbf16>
    %c64_88 = arith.constant 64 : index
    %c0_89 = arith.constant 0 : index
    %62 = vector.load %arg9[%c64_88, %c0_89] : memref<72x180xbf16, #tpu.memory_space<vmem>>, vector<8x144xbf16>
    tpu.vector_store %arg9[%c64_88, %c0_89], %61 {strides = array<i32>} : memref<72x180xbf16, #tpu.memory_space<vmem>>, vector<8x144xbf16>,
    %c0_90 = arith.constant 0 : index
    %c0_91 = arith.constant 0 : index
    %63 = vector.load %arg6[%c0_90, %c0_91] : memref<8x72xbf16, #tpu.memory_space<vmem>>, vector<8x72xbf16>
    %c0_92 = arith.constant 0 : index
    %c0_93 = arith.constant 0 : index
    %64 = vector.load %arg9[%c0_92, %c0_93] : memref<72x180xbf16, #tpu.memory_space<vmem>>, vector<72x144xbf16>
    %cst_94 = arith.constant dense<0.000000e+00> : vector<8x144xf32>
    %65 = tpu.matmul %63, %64, %cst_94 {dimension_numbers = #tpu.dot_dimension_numbers<[1], [0], [0], [1], [0, 0, 1, 1], [], []>} : vector<8x72xbf16>, vector<72x144xbf16>, vector<8x144xf32> -> vector<8x144xf32>
    %c0_95 = arith.constant 0 : index
    %c0_96 = arith.constant 0 : index
    %66 = vector.load %arg7[%c0_95, %c0_96] : memref<8x1xf32, #tpu.memory_space<vmem>>, vector<8x1xf32>
    %67 = vector.broadcast %66 : vector<8x1xf32> to vector<8x144xf32>
    %68 = arith.addf %65, %67 : vector<8x144xf32>
    %c0_97 = arith.constant 0 : index
    %c0_98 = arith.constant 0 : index
    %c0_99 = arith.constant 0 : index
    %c37_100 = arith.constant 37 : index
    %69 = vector.load %arg2[%c0_97, %c0_98, %c0_99, %c37_100] : memref<1x1x8x218xbf16, #tpu.memory_space<vmem>>, vector<1x1x8x144xbf16>
    %70 = vector.shape_cast %69 : vector<1x1x8x144xbf16> to vector<8x144xbf16>
    %71 = arith.extf %70 : vector<8x144xbf16> to vector<8x144xf32>
    %cst_101 = arith.constant 1.000000e+00 : f32
    %72 = vector.broadcast %cst_101 : f32 to vector<8x144xf32>
    %73 = arith.mulf %68, %72 : vector<8x144xf32>
    %74 = arith.addf %73, %71 : vector<8x144xf32>
    %c0_102 = arith.constant 0 : index
    %c0_103 = arith.constant 0 : index
    %c0_104 = arith.constant 0 : index
    %c0_105 = arith.constant 0 : index
    %75 = vector.load %arg8[%c0_102, %c0_103, %c0_104, %c0_105] : memref<1x1x8x144xf32, #tpu.memory_space<vmem>>, vector<1x1x8x144xf32>
    %76 = vector.shape_cast %75 : vector<1x1x8x144xf32> to vector<8x144xf32>
    %77 = vector.shape_cast %74 : vector<8x144xf32> to vector<1x1x8x144xf32>
    tpu.vector_store %arg8[%c0_102, %c0_103, %c0_104, %c0_105], %77 {strides = array<i32>} : memref<1x1x8x144xf32, #tpu.memory_space<vmem>>, vector<1x1x8x144xf32>,
    return
  }
  func.func @transform_0(%arg0: i32, %arg1: i32) -> (i32, i32, i32, i32) {
    %c0_i32 = arith.constant 0 : i32
    %c0_i32_0 = arith.constant 0 : i32
    %c0_i32_1 = arith.constant 0 : i32
    return %arg0, %arg1, %c0_i32, %c0_i32_0 : i32, i32, i32, i32
  }
  func.func @transform_1(%arg0: i32, %arg1: i32) -> (i32, i32, i32) {
    %c0_i32 = arith.constant 0 : i32
    %c0_i32_0 = arith.constant 0 : i32
    %c0_i32_1 = arith.constant 0 : i32
    return %arg1, %c0_i32, %c0_i32_0 : i32, i32, i32
  }
  func.func @transform_2(%arg0: i32, %arg1: i32) -> (i32, i32) {
    %c0_i32 = arith.constant 0 : i32
    %c0_i32_0 = arith.constant 0 : i32
    %c0_i32_1 = arith.constant 0 : i32
    return %c0_i32, %c0_i32_0 : i32, i32
  }
  func.func @transform_3(%arg0: i32, %arg1: i32) -> (i32, i32) {
    %c0_i32 = arith.constant 0 : i32
    %c0_i32_0 = arith.constant 0 : i32
    %c0_i32_1 = arith.constant 0 : i32
    return %c0_i32, %c0_i32_0 : i32, i32
  }
  func.func @transform_4(%arg0: i32, %arg1: i32) -> (i32, i32) {
    %c0_i32 = arith.constant 0 : i32
    %c0_i32_0 = arith.constant 0 : i32
    %c0_i32_1 = arith.constant 0 : i32
    return %c0_i32, %c0_i32_0 : i32, i32
  }
  func.func @transform_5(%arg0: i32, %arg1: i32) -> (i32, i32) {
    %c0_i32 = arith.constant 0 : i32
    %c0_i32_0 = arith.constant 0 : i32
    %c0_i32_1 = arith.constant 0 : i32
    return %c0_i32, %c0_i32_0 : i32, i32
  }
  func.func @transform_6(%arg0: i32, %arg1: i32) -> (i32, i32, i32, i32) {
    %c0_i32 = arith.constant 0 : i32
    %c0_i32_0 = arith.constant 0 : i32
    %c0_i32_1 = arith.constant 0 : i32
    return %arg0, %arg1, %c0_i32, %c0_i32_0 : i32, i32, i32, i32
  }
}

</mosaic_0001>

<bundles_post_ra>
// kernel: tpu_custom_call.1
= control target key start
LH: loop header
LB: loop body
LE: loop exit
PB: predicated region body
PF: predicated region fallthrough
CT: control target
= control target key end

     0   :  { %11 = vsyncpa [#allocation5], 0  ;;  %s1504_s0 = inlined_call_operand.hbm [shape: bf16[2,2,8,218], index: 0, kind: input, shape index: {}]   ;;  %s1505_s1 = inlined_call_operand.vmem [shape: f32[2,1,180], index: 1, kind: input, shape index: {}]   ;;  %s1506_s2 = inlined_call_operand.vmem [shape: bf16[8,72], index: 2, kind: input, shape index: {}]   ;;  %s1507_s3 = inlined_call_operand.vmem [shape: f32[8,1], index: 3, kind: input, shape index: {}]   ;;  %s1508_s4 = inlined_call_operand.vmem [shape: bf16[8,72], index: 4, kind: input, shape index: {}]   ;;  %s1509_s5 = inlined_call_operand.vmem [shape: f32[8,1], index: 5, kind: input, shape index: {}]   ;;  %s1510_s6 = inlined_call_operand.hbm [shape: f32[2,2,8,144], index: 6, kind: output, shape index: {}]  }
   0x1   :  { %13 = vsyncpa [#allocation5 + $0x1], 0 }
   0x2   :  { %14 = vsyncpa [#allocation6], 0 }
   0x3   :  { %16 = vsyncpa [#allocation6 + $0x1], 0  ;;  %s1187_s21 = smov 0   ;;  %s1189_s22 = smov 0  }
   0x4   :  { %s1191_s23 = smov 0   ;;  %s1193_s24 = smov 0  }
   0x5   :  { %s1195_s25 = smov 0   ;;  %s1197_s26 = smov 0  }
   0x6   :  { %s1199_s27 = smov 0   ;;  %s1201_s28 = smov 0  }
   0x7 LB: > { %1518 = sst [smem:[#allocation10_spill]] %s1110_s21  ;;  %s843_s29 = sadd.s32 4294967295, %s1138_s28   ;;  %s1138_s28 = sphi %s1201_s28, %s22_s28   ;;  %s1134_s27 = sphi %s1199_s27, %s1545_s27   ;;  %s1130_s26 = sphi %s1197_s26, %s1544_s26   ;;  %s1126_s25 = sphi %s1195_s25, %s1543_s25   ;;  %s1122_s24 = sphi %s1193_s24, %s1542_s24   ;;  %s1118_s23 = sphi %s1191_s23, %s1541_s23   ;;  %s1114_s22 = sphi %s1189_s22, %s1540_s22   ;;  %s1110_s21 = sphi %s1187_s21, %s1539_s21  }
   0x8   : > { %s844_s30 = sadd.s32 4294967294, %s1138_s28   ;;  %s31_s7 = sadd.s32 1, %s1130_s26 }
   0x9   : > { %s34_s8 = sadd.s32 1, %s1134_s27  ;;  %p32_p0 = scmp.ge.s32.totalorder %s31_s7, 2 }
   0xa   : > { %s43_s9 = sadd.s32 1, %s1118_s23  ;;  %p50_p1 = scmp.ne.s32.totalorder %s1118_s23, %s1114_s22 }
   0xb   : > { %p51_p2 = scmp.eq.s32.totalorder %s1138_s28, 0  ;;  %s1547_s7 = smov (%p32_p0, %s31_s7), 0 }
   0xc   : > { %1519 = sst [smem:[#allocation11_spill]] %s1547_s7  ;;  %s1549_s8 = smov (!%p32_p0, %s34_s8), %s1134_s27 }
   0xd   : > { %s39_s10 = ssub.s32 %s1130_s26, %s1547_s7  ;;  %p1240_p3 = por %p51_p2, %p50_p1 }
   0xe   : > { %p36_p4 = scmp.ge.s32.totalorder %s1549_s8, 2  ;;  %p56_p5 = scmp.ne.s32.totalorder %s1114_s22, %s1110_s21 }
   0xf   : > { %p57_p6 = scmp.eq.s32.totalorder %s843_s29, 0  ;;  %p192_p7 = scmp.eq.s32.totalorder %s843_s29, 3 }
  0x10   : > { %s1551_s8 = smov (%p36_p4, %s1549_s8), 0  ;;  %p198_p10 = scmp.eq.s32.totalorder %s844_s30, 3 }
  0x11   : > { %1521 = sst [smem:[#allocation12_spill]] %s1551_s8  ;;  %p1248_p8 = por %p57_p6, %p56_p5 }
  0x12   : > { %p1252_p9 = por %p192_p7, %p50_p1  ;;  %s38_s14 = ssub.s32 %s1134_s27, %s1551_s8 }
  0x13   : > { %s40_s15 = sor.u32 %s39_s10, %s38_s14  ;;  %p1258_p12 = por %p198_p10, %p56_p5 }
  0x14   : > { %s1523_s13 = scalar_select %p1252_p9, 1, 0 }
  0x15   : > { %p41_p11 = scmp.eq.s32.totalorder %s40_s15, 0  ;;  %p899_p13 = scmp.lt.s32.totalorder %s1138_s28, 4 }
  0x16   : > { %s1524_s16 = scalar_select %p1258_p12, 1, 0 }
  0x17   : > { %s230_s17 = sand.u32 1, %s1118_s23   ;;  %s848_s20 = sshll.u32 %s1130_s26, 1 }
  0x18   : > { %s1265_s18 = scalar_select %p41_p11, %s1118_s23, %s43_s9  }
  0x19   : > { %s847_s19 = sshll.u32 %s230_s17, 3  ;;  %s849_s29 = sshll.u32 %s1134_s27, 2 }
  0x1a   : > { %s234_s7 = scalar_lea.vmem [#allocation4], %s847_s19  ;;  %s240_s8 = sadd.s32 %s849_s29, %s848_s20 }
  0x1b   : > { %s244_s21 = sshll.u32 %s234_s7, 4  ;;  %s850_s30 = sshll.u32 %s240_s8, 6  ;;  %s1269_s21 = int_to_ptr.vmem [resolvable:$true] %s244_s21 }
  0x1c   : > { %p1273_p0 = pnand %p899_p13, %p1240_p3  ;;  %s1280_s9 = scalar_lea.hbm %s1504_s0, %s850_s30 }
  0x1d   : > { %s231_s7 = scalar_lea.sflag [#allocation5], %s230_s17  ;;  %s1010_s8 = scalar_lea.hbm %s1280_s9, 128 }
  0x1e   : > { %p1011_p4 = scmp.ne.s32.totalorder %s1280_s9, %s1010_s8  ;;  %p1012_p3 = pneg %p1273_p0 }
  0x1f   : > { %s1015_s20 = scalar_lea.hbm %s1504_s0, 512  ;;  %p1016_p7 = scmp.lt.u32.totalorder %s1280_s9, %s1504_s0 }
  0x20   : > { %p1013_p5 = pnand %p1012_p3, %p1011_p4  ;;  %p1017_p10 = scmp.lt.u32.totalorder %s1015_s20, %s1010_s8 }
  0x21   : > { %p1019_p13 = scmp.lt.u32.totalorder %s1010_s8, %s1280_s9 }
  0x22   : > { %p1014_p6 = pneg %p1013_p5  ;;  %p1018_p11 = por %p1017_p10, %p1016_p7 }
  0x24   : > { %p1020_p1 = por %p1019_p13, %p1018_p11 }
  0x26   : > { %p1021_p2 = pnand %p1020_p1, %p1014_p6 }
  0x28   : > { %1024 = shalt.err (!%p1021_p2)
}
  0x29   : > { %s1025_s17 = scalar_lea.vmem %s1269_s21, 128  ;;  %s1140_s14 = smov [#allocation4]  }
  0x2a   : > { %p1026_p4 = scmp.ne.s32.totalorder %s1269_s21, %s1025_s17  ;;  %s1030_s15 = sshll.u32 %s1140_s14, 4  ;;  %s1031_s15 = int_to_ptr.vmem [resolvable:$false] %s1030_s15 }
  0x2b   : > { %s1032_s11 = scalar_lea.vmem %s1031_s15, 256  ;;  %p1033_p9 = scmp.lt.s32.totalorder %s1269_s21, %s1031_s15 }
  0x2c   : > { %p1028_p5 = pnand %p1026_p4, %p1012_p3  ;;  %p1034_p7 = scmp.lt.s32.totalorder %s1032_s11, %s1025_s17 }
  0x2e   : > { %p1029_p12 = pneg %p1028_p5  ;;  %p1035_p10 = por %p1034_p7, %p1033_p9 }
  0x30   : > { %p1036_p11 = pnand %p1035_p10, %p1029_p12 }
  0x32   : > { %1039 = shalt.err (!%p1036_p11)
}
  0x33   : > { %894 = dma.hbm_to_vmem [thread:$0]  (!%p1273_p0), %s1280_s9, 128, %s1269_s21, %s231_s7  }
  0x34   : > { %p1526_p1 = scmp.lt.s32.totalorder %s1138_s28, 5  ;;  %p1527_p2 = scmp.ge.s32.totalorder %s1138_s28, 1 }
  0x36   : > { %p257_p3 = pnand %p1527_p2, %p1526_p1 }
  0x37   : > { %s1314_s8 = sand.u32 (!%p257_p3), 1, %s1114_s22  }
  0x38   : > { %260 = sbr.rel (%p257_p3) target bundleno = 935 (0x3a7), region = 44  ;;  %s852_s19 = sshll.u32 (!%p257_p3), %s1314_s8, 3 }
  0x39   : > { %s263_s20 = scalar_lea.sflag (!%p257_p3), [#allocation5], %s1314_s8  ;;  %s266_s29 = scalar_lea.vmem (!%p257_p3), [#allocation4], %s852_s19 }
  0x3f   : > { %1101 = dma.done.wait (%p1248_p8), %s263_s20, 128  }
  0x40   : > { %1103 = vsyncadd (%p1248_p8), %s263_s20, 4294967168  ;;  %vm305_vm0 = vcmask 1043456   ;;  %vm306_vm1 = vcmask 424964   ;;  %v1327_v1 = vld [vmem:[%s266_s29] sm:$0xff]  ;;  %s1141_s21 = smov 127   ;;  %s1142_s10 = smov 110   ;;  %v497_v41 = vlaneseq }
  0x41   : > { %vm1323_vm2 = vmor %vm306_vm1, %vm305_vm0  ;;  %311 = vrot.lane.b32.xlu0 %v1327_v1, %s1141_s21  ;;  %329 = vrot.lane.b32.xlu1 %v1327_v1, %s1142_s10  ;;  %s1143_s12 = smov 126   ;;  %s1144_s9 = smov 109   ;;  %v1149_v2 = vmov 0   ;;  %v391_v3 = vld [vmem:[%s1507_s3] sm:$0xff]  ;;  %vm314_vm3 = vcmask 1039360   ;;  %vm332_vm4 = vcmask 900096  }
  0x42   : > { %308 = vst.msk [vmem:[#allocation2] sm:$0xff] %vm1323_vm2, %v1327_v1  ;;  %s1145_s7 = smov 108   ;;  %s1146_s30 = smov 92   ;;  %484 = vmatprep.mubr.bf16.mxu0 %v1149_v2  ;;  %975 = vset.pattern.permute.xlu0 %v1149_v2  ;;  %vm323_vm5 = vcmask 1031168   ;;  %vm341_vm6 = vcmask 891904   ;;  %vm350_vm7 = vcmask 883712  }
  0x43   : > { %s1515_s17 = smov 91   ;;  %s1517_s14 = smov 90   ;;  %700 = vmatprep.mubr.bf16.mxu1 %v1149_v2  ;;  %976 = vset.pattern.permute.xlu1 %v1149_v2  ;;  %vm359_vm8 = vcmask 752640   ;;  %vm368_vm9 = vcmask 744448   ;;  %vm377_vm10 = vcmask 736256   ;;  %vm442_vm11 = vcmask 588800  }
  0x44   : > { %v381_v40 = vld [vmem:[%s1506_s2] sm:$0xf]  ;;  %vm511_vm12 = vcmask 3072   ;;  %vm513_vm13 = vcmask 437672   ;;  %p299_p8 = scmp.lt.s32.totalorder %s1122_s24, 1  ;;  %v498_v42 = vshrl.u32 %v497_v41, 7 }
  0x45   : > { %320 = vrot.lane.b32.xlu0 %v1327_v1, %s1143_s12  ;;  %338 = vrot.lane.b32.xlu1 %v1327_v1, %s1144_s9  ;;  %512 = vst.msk [vmem:[#allocation3] sm:$0xf] %vm511_vm12, %v1149_v2  ;;  %s1150_s19 = smov 1   ;;  %vm526_vm14 = vcmask 1043464   ;;  %vm527_vm15 = vcmask 433156   ;;  %vm523_vm1 = vcmask 7168  }
  0x46   : > { %514 = vst.msk [vmem:[#allocation3 + $0x4] sm:$0xf] %vm513_vm13, %v1149_v2  ;;  %s300_s29 = scalar_select %p299_p8, %s1122_s24, 1  ;;  %v499_v43 = vsub.s32 0, %v498_v42  ;;  %v503_v46 = vsub.s32 1, %v498_v42  ;;  %vm531_vm12 = vcmask 130052  }
  0x47   : > { %vm1393_vm13 = vmor %vm531_vm12, %vm305_vm0  ;;  %v608_v2 = vld [vmem:[%s1509_s5] sm:$0xff]  ;;  %p1534_p12 = scmp.ne.s32.totalorder %s1523_s13, 0 }
  0x48   : > { %s854_s15 = sshll.u32 %s300_s29, 1  ;;  %v598_v41 = vld [vmem:[%s1508_s4] sm:$0xf]  ;;  %s1151_s29 = smov [#allocation7]  }
  0x49   : > { %347 = vrot.lane.b32.xlu0 %v1327_v1, %s1145_s7  ;;  %356 = vrot.lane.b32.xlu1 %v1327_v1, %s1146_s30 }
  0x4d   : > { %365 = vrot.lane.b32.xlu0 %v1327_v1, %s1515_s17  ;;  %374 = vrot.lane.b32.xlu1 %v1327_v1, %s1517_s14  ;;  %s302_s14 = scalar_lea.vmem %s1505_s1, %s854_s15  ;;  %s1532_s17 = smov 90  }
  0x4e   : > { %v495_v45 = vld [vmem:[%s302_s14] sm:$0x3]  ;;  %s1533_s14 = smov 91  }
  0x4f   : > { %v500_v49 = vrot.slane %v495_v45, %v499_v43  ;;  %v504_v52 = vrot.slane %v495_v45, %v503_v46 }
  0x51   : > { %394 = vperm.xlu0 %975, %v391_v3   ;;  %v710_v3 = vunpack.c.l.bf16 %v1327_v1 }
  0xb3   : > { %v312_v4 = vpop.permute.xlu0 %311  ;;  %v330_v5 = vpop.permute.xlu1 %329 }
  0xb4   : > { %v313_v6 = vrot.slane %v312_v4, 4  ;;  %v331_v7 = vrot.slane %v330_v5, 4 }
  0xb6   : > { %v315_v8 = vsel %vm314_vm3, %v312_v4, %v313_v6  ;;  %v333_v9 = vsel %vm332_vm4, %v330_v5, %v331_v7  ;;  %v711_v4 = vunpack.c.h.bf16 %v1327_v1 }
  0xb7   : > { %317 = vst.msk [vmem:[#allocation2 + $0x8] sm:$0xff] %vm1323_vm2, %v315_v8  ;;  %335 = vst.msk [vmem:[#allocation2 + $0x18] sm:$0xff] %vm1323_vm2, %v333_v9  ;;  %v321_v10 = vpop.permute.xlu0 %320  ;;  %v339_v11 = vpop.permute.xlu1 %338 }
  0xb8   : > { %v322_v12 = vrot.slane %v321_v10, 4  ;;  %v340_v13 = vrot.slane %v339_v11, 4  ;;  %v977_v5 = vpack.i.bf16 %v711_v4, %v710_v3 }
  0xba   : > { %v324_v14 = vsel %vm323_vm5, %v321_v10, %v322_v12  ;;  %v342_v15 = vsel %vm341_vm6, %v339_v11, %v340_v13 }
  0xbb   : > { %326 = vst.msk [vmem:[#allocation2 + $0x10] sm:$0xff] %vm1323_vm2, %v324_v14  ;;  %344 = vst.msk [vmem:[#allocation2 + $0x20] sm:$0xff] %vm1323_vm2, %v342_v15  ;;  %v348_v16 = vpop.permute.xlu0 %347  ;;  %v357_v17 = vpop.permute.xlu1 %356 }
  0xbc   : > { %v349_v18 = vrot.slane %v348_v16, 4  ;;  %v358_v19 = vrot.slane %v357_v17, 4 }
  0xbe   : > { %v351_v20 = vsel %vm350_vm7, %v348_v16, %v349_v18  ;;  %v360_v21 = vsel %vm359_vm8, %v357_v17, %v358_v19  ;;  %v982_v22 = vld [vmem:[#allocation2 + $0x4] ss:$8 sps:$4 sm:$0xff]   ;;  %v984_v23 = vld [vmem:[#allocation2] ss:$8 sps:$4 sm:$0xff]  }
  0xbf   : > { %353 = vst.msk [vmem:[#allocation2 + $0x28] sm:$0xff] %vm1323_vm2, %v351_v20  ;;  %362 = vst.msk [vmem:[#allocation2 + $0x30] sm:$0xff] %vm1323_vm2, %v360_v21  ;;  %v366_v24 = vpop.permute.xlu0 %365  ;;  %v375_v25 = vpop.permute.xlu1 %374  ;;  %452 = vmatprep.subr.bf16.mxu0 %v982_v22 }
  0xc0   : > { %v367_v26 = vrot.slane %v366_v24, 4  ;;  %v376_v27 = vrot.slane %v375_v25, 4  ;;  %453 = vmatpush1.bf16.msra.mxu0 %v984_v23 }
  0xc2   : > { %v369_v28 = vsel %vm368_vm9, %v366_v24, %v367_v26  ;;  %v378_v29 = vsel %vm377_vm10, %v375_v25, %v376_v27  ;;  %v985_v30 = vld [vmem:[#allocation2 + $0x14] ss:$8 sps:$4 sm:$0xff]   ;;  %v987_v31 = vld [vmem:[#allocation2 + $0x10] ss:$8 sps:$4 sm:$0xff]  }
  0xc3   : > { %371 = vst.msk [vmem:[#allocation2 + $0x38] sm:$0xff] %vm1323_vm2, %v369_v28  ;;  %380 = vst.msk [vmem:[#allocation2 + $0x40] sm:$0xff] %vm1323_vm2, %v378_v29  ;;  %454 = vmatprep.subr.bf16.mxu0 %v985_v30 }
  0xc4   : > { %455 = vmatpush1.bf16.msra.mxu0 %v987_v31  ;;  %vm528_vm2 = vmor %vm527_vm15, %vm526_vm14 }
  0xc6   : > { %v988_v32 = vld [vmem:[#allocation2 + $0x24] ss:$8 sps:$4 sm:$0xff]   ;;  %v990_v33 = vld [vmem:[#allocation2 + $0x20] ss:$8 sps:$4 sm:$0xff]  }
  0xc7   : > { %456 = vmatprep.subr.bf16.mxu0 %v988_v32 }
  0xc8   : > { %457 = vmatpush1.bf16.msra.mxu0 %v990_v33 }
  0xca   : > { %v991_v34 = vld [vmem:[#allocation2 + $0x34] ss:$8 sps:$4 sm:$0xff]   ;;  %v993_v35 = vld [vmem:[#allocation2 + $0x30] ss:$8 sps:$4 sm:$0xff]   ;;  %v390_v36 = vld [vmem:[#allocation2 + $0x40] sm:$0xff] }
  0xcb   : > { %458 = vmatprep.subr.bf16.mxu0 %v991_v34  ;;  %v864_v37 = vcombine.high %v390_v36, %v390_v36  ;;  %v863_v38 = vcombine.low %v390_v36, %v390_v36 }
  0xcc   : > { %459 = vmatpush1.bf16.msra.mxu0 %v993_v35 }
  0xcd   : > { %865 = vmatprep.subr.msk.bf16.mxu0 %vm305_vm0, %v864_v37  ;;  %v447_v39 = vsel %vm305_vm0, %v863_v38, 0 }
  0xd0   : > { %461 = vmatpush1.bf16.msra.mxu0 %v447_v39  ;;  %v395_v44 = vpop.permute.xlu0 %394 }
  0xd3   : > { %866 = vmatmul.mubr.msk.bf16.vlgmr.msra.gmra.mrb[0].mxu0 %vm442_vm11, %v381_v40 }
 0x1a6   : > { %v486_v47 = vpop.f32.mrb[0].mxu0 }
 0x1a7   : > { %v487_v48 = vadd.f32 %v486_v47, %v395_v44  ;;  %v488_v50 = vpop.f32.mrb[1].mxu0 }
 0x1a8   : > { %v489_v51 = vadd.f32 %v488_v50, %v395_v44  ;;  %v490_v53 = vpop.f32.mrb[2].mxu0 }
 0x1a9   : > { %v493_v54 = vmax.f32 %v487_v48, 0.0  ;;  %v491_v55 = vpop.f32.mrb[3].mxu0 }
 0x1aa   : > { %v494_v56 = vmax.f32 %v489_v51, 0.0 }
 0x1ab   : > { %v507_v57 = vmul.f32 %v500_v49, %v493_v54 }
 0x1ac   : > { %v508_v58 = vmul.f32 %v504_v52, %v494_v56 }
 0x1ae   : > { %v886_v59 = vpack.c.bf16 %v508_v58, %v507_v57 }
 0x1b0   : > { %520 = vrot.lane.b32.xlu1 %v886_v59, %s1150_s19 }
 0x222   : > { %v521_v60 = vpop.permute.xlu1 %520 }
 0x223   : > { %v522_v61 = vrot.slane %v521_v60, 4 }
 0x225   : > { %v524_v62 = vsel %vm523_vm1, %v522_v61, %v521_v60 }
 0x226   : > { %529 = vst.msk [vmem:[#allocation3] sm:$0xff] %vm528_vm2, %v524_v62 }
 0x22d   : > { %v542_v0 = vld [vmem:[#allocation3] sm:$0xff] }
 0x22e   : > { %544 = vrot.lane.b32.xlu0 %v542_v0, %s1143_s12  ;;  %536 = vrot.lane.b32.xlu1 %v542_v0, %s1141_s21  ;;  %533 = vst.msk [vmem:[#allocation2] sm:$0xff] %vm1393_vm13, %v542_v0  ;;  %s853_s12 = sshll.u32 %s1314_s8, 4  ;;  %s1044_s21 = sshll.u32 %s1151_s29, 4  ;;  %s1045_s21 = int_to_ptr.vmem [resolvable:$false] %s1044_s21 }
 0x22f   : > { %s298_s11 = scalar_lea.vmem [#allocation7], %s853_s12 }
 0x230   : > { %s744_s19 = sshll.u32 %s298_s11, 4  ;;  %s1452_s19 = int_to_ptr.vmem [resolvable:$true] %s744_s19 }
 0x231   : > { %s1040_s20 = scalar_lea.vmem %s1452_s19, 256  ;;  %p1047_p13 = scmp.lt.s32.totalorder %s1452_s19, %s1045_s21 }
 0x232   : > { %560 = vrot.lane.b32.xlu0 %v542_v0, %s1144_s9  ;;  %552 = vrot.lane.b32.xlu1 %v542_v0, %s1142_s10  ;;  %s881_s9 = sshll.u32 %s1122_s24, 1  ;;  %p1041_p9 = scmp.ne.s32.totalorder %s1452_s19, %s1040_s20 }
 0x233   : > { %s1046_s10 = scalar_lea.vmem %s1045_s21, 512 }
 0x234   : > { %p1042_p0 = pnand %p1041_p9, %p1534_p12  ;;  %p1048_p4 = scmp.lt.s32.totalorder %s1046_s10, %s1040_s20 }
 0x236   : > { %576 = vrot.lane.b32.xlu0 %v542_v0, %s1146_s30  ;;  %568 = vrot.lane.b32.xlu1 %v542_v0, %s1145_s7  ;;  %s882_s7 = sshll.u32 %s1126_s25, 2  ;;  %p1043_p6 = pneg %p1042_p0 }
 0x237   : > { %s740_s30 = sadd.s32 %s882_s7, %s881_s9  ;;  %p1049_p5 = por %p1048_p4, %p1047_p13 }
 0x238   : > { %s883_s15 = sshll.u32 %s740_s30, 7 }
 0x239   : > { %p1050_p7 = pnand %p1049_p5, %p1043_p6 }
 0x23a   : > { %592 = vrot.lane.b32.xlu0 %v542_v0, %s1532_s17  ;;  %584 = vrot.lane.b32.xlu1 %v542_v0, %s1533_s14  ;;  %s1450_s17 = scalar_lea.hbm %s1510_s6, %s883_s15 }
 0x23e   : > { %611 = vperm.xlu1 %976, %v608_v2   ;;  %978 = vrot.lane.b32.xlu0 %v977_v5, %s1533_s14  ;;  %s728_s14 = scalar_lea.sflag [#allocation6], %s1314_s8 }
 0x2a0   : > { %v545_v6 = vpop.permute.xlu0 %544  ;;  %v537_v7 = vpop.permute.xlu1 %536 }
 0x2a1   : > { %v546_v8 = vrot.slane %v545_v6, 4  ;;  %v538_v9 = vrot.slane %v537_v7, 4 }
 0x2a3   : > { %v547_v10 = vsel %vm323_vm5, %v545_v6, %v546_v8  ;;  %v539_v11 = vsel %vm314_vm3, %v537_v7, %v538_v9 }
 0x2a4   : > { %549 = vst.msk [vmem:[#allocation2 + $0x10] sm:$0xff] %vm1393_vm13, %v547_v10  ;;  %541 = vst.msk [vmem:[#allocation2 + $0x8] sm:$0xff] %vm1393_vm13, %v539_v11  ;;  %v561_v12 = vpop.permute.xlu0 %560  ;;  %v553_v1 = vpop.permute.xlu1 %552 }
 0x2a5   : > { %v562_v13 = vrot.slane %v561_v12, 4  ;;  %v554_v14 = vrot.slane %v553_v1, 4 }
 0x2a7   : > { %v563_v15 = vsel %vm341_vm6, %v561_v12, %v562_v13  ;;  %v555_v16 = vsel %vm332_vm4, %v553_v1, %v554_v14 }
 0x2a8   : > { %565 = vst.msk [vmem:[#allocation2 + $0x20] sm:$0xff] %vm1393_vm13, %v563_v15  ;;  %557 = vst.msk [vmem:[#allocation2 + $0x18] sm:$0xff] %vm1393_vm13, %v555_v16  ;;  %v577_v17 = vpop.permute.xlu0 %576  ;;  %v569_v18 = vpop.permute.xlu1 %568 }
 0x2a9   : > { %v578_v19 = vrot.slane %v577_v17, 4  ;;  %v570_v20 = vrot.slane %v569_v18, 4 }
 0x2ab   : > { %v579_v21 = vsel %vm359_vm8, %v577_v17, %v578_v19  ;;  %v571_v22 = vsel %vm350_vm7, %v569_v18, %v570_v20  ;;  %v996_v23 = vld [vmem:[#allocation2 + $0x4] ss:$8 sps:$4 sm:$0xff]   ;;  %v998_v24 = vld [vmem:[#allocation2] ss:$8 sps:$4 sm:$0xff]  }
 0x2ac   : > { %581 = vst.msk [vmem:[#allocation2 + $0x30] sm:$0xff] %vm1393_vm13, %v579_v21  ;;  %573 = vst.msk [vmem:[#allocation2 + $0x28] sm:$0xff] %vm1393_vm13, %v571_v22  ;;  %v593_v25 = vpop.permute.xlu0 %592  ;;  %v585_v26 = vpop.permute.xlu1 %584  ;;  %668 = vmatprep.subr.bf16.mxu1 %v996_v23 }
 0x2ad   : > { %v594_v27 = vrot.slane %v593_v25, 4  ;;  %v586_v28 = vrot.slane %v585_v26, 4  ;;  %669 = vmatpush1.bf16.msra.mxu1 %v998_v24 }
 0x2af   : > { %v595_v29 = vsel %vm377_vm10, %v593_v25, %v594_v27  ;;  %v587_v30 = vsel %vm368_vm9, %v585_v26, %v586_v28  ;;  %v999_v31 = vld [vmem:[#allocation2 + $0x14] ss:$8 sps:$4 sm:$0xff]   ;;  %v1001_v32 = vld [vmem:[#allocation2 + $0x10] ss:$8 sps:$4 sm:$0xff]  }
 0x2b0   : > { %597 = vst.msk [vmem:[#allocation2 + $0x40] sm:$0xff] %vm1393_vm13, %v595_v29  ;;  %589 = vst.msk [vmem:[#allocation2 + $0x38] sm:$0xff] %vm1393_vm13, %v587_v30  ;;  %670 = vmatprep.subr.bf16.mxu1 %v999_v31  ;;  %v979_v42 = vpop.permute.xlu0 %978 }
 0x2b1   : > { %671 = vmatpush1.bf16.msra.mxu1 %v1001_v32  ;;  %v981_v43 = vunpack.i.h.bf16 %v979_v42  ;;  %v980_v44 = vunpack.i.l.bf16 %v979_v42 }
 0x2b3   : > { %v1002_v33 = vld [vmem:[#allocation2 + $0x24] ss:$8 sps:$4 sm:$0xff]   ;;  %v1004_v34 = vld [vmem:[#allocation2 + $0x20] ss:$8 sps:$4 sm:$0xff]   ;;  %v719_v47 = vsel %vm368_vm9, %v980_v44, %v981_v43 }
 0x2b4   : > { %672 = vmatprep.subr.bf16.mxu1 %v1002_v33 }
 0x2b5   : > { %673 = vmatpush1.bf16.msra.mxu1 %v1004_v34 }
 0x2b7   : > { %v1005_v35 = vld [vmem:[#allocation2 + $0x34] ss:$8 sps:$4 sm:$0xff]   ;;  %v1007_v36 = vld [vmem:[#allocation2 + $0x30] ss:$8 sps:$4 sm:$0xff]   ;;  %v607_v37 = vld [vmem:[#allocation2 + $0x40] sm:$0xff] }
 0x2b8   : > { %674 = vmatprep.subr.bf16.mxu1 %v1005_v35  ;;  %v877_v38 = vcombine.high %v607_v37, %v607_v37  ;;  %v876_v39 = vcombine.low %v607_v37, %v607_v37 }
 0x2b9   : > { %675 = vmatpush1.bf16.msra.mxu1 %v1007_v36 }
 0x2ba   : > { %878 = vmatprep.subr.msk.bf16.mxu1 %vm305_vm0, %v877_v38  ;;  %v663_v40 = vsel %vm305_vm0, %v876_v39, 0  ;;  %vm725_vm0 = vcmask 130048  }
 0x2bd   : > { %677 = vmatpush1.bf16.msra.mxu1 %v663_v40  ;;  %v612_v45 = vpop.permute.xlu1 %611 }
 0x2c0   : > { %879 = vmatmul.mubr.msk.bf16.vlgmr.msra.gmra.mrb[0].mxu1 %vm442_vm11, %v598_v41 }
 0x393   : > { %v702_v46 = vpop.f32.mrb[0].mxu1 }
 0x394   : > { %v703_v48 = vadd.f32 %v702_v46, %v612_v45  ;;  %v704_v49 = vpop.f32.mrb[1].mxu1 }
 0x395   : > { %v705_v50 = vadd.f32 %v704_v49, %v612_v45  ;;  %v706_v51 = vpop.f32.mrb[2].mxu1 }
 0x396   : > { %v722_v52 = vadd.f32 %v719_v47, %v703_v48  ;;  %v707_v53 = vpop.f32.mrb[3].mxu1 }
 0x397   : > { %v723_v54 = vadd.f32 %v981_v43, %v705_v50 }
 0x398   : > { %724 = vst [vmem:[%s298_s11] sm:$0xff] %v722_v52 }
 0x399   : > { %726 = vst.msk [vmem:[%s298_s11 + $0x8] sm:$0xff] %vm725_vm0, %v723_v54 }
 0x39a   : > { %1053 = shalt.err (!%p1050_p7)
}
 0x39b   : > { %s1054_s8 = scalar_lea.hbm %s1450_s17, 256  ;;  %s1058_s7 = scalar_lea.hbm %s1510_s6, 1024 }
 0x39c   : > { %p1055_p10 = scmp.ne.s32.totalorder %s1450_s17, %s1054_s8  ;;  %p1059_p2 = scmp.lt.u32.totalorder %s1450_s17, %s1510_s6 }
 0x39d   : > { %p1060_p3 = scmp.lt.u32.totalorder %s1058_s7, %s1054_s8  ;;  %p1062_p9 = scmp.lt.u32.totalorder %s1054_s8, %s1450_s17 }
 0x39e   : > { %p1056_p11 = pnand %p1055_p10, %p1534_p12 }
 0x39f   : > { %p1061_p8 = por %p1060_p3, %p1059_p2 }
 0x3a0   : > { %p1057_p1 = pneg %p1056_p11 }
 0x3a1   : > { %p1063_p0 = por %p1062_p9, %p1061_p8 }
 0x3a3   : > { %p1064_p6 = pnand %p1063_p0, %p1057_p1 }
 0x3a5   : > { %1067 = shalt.err (!%p1064_p6)
}
 0x3a6   : > { %889 = dma.vmem_to_hbm [thread:$0]  (%p1534_p12), %s1452_s19, 256, %s1450_s17, %s728_s14  }
 0x3a7 PF: > { %s1535_s11 = sld [smem:[#allocation10_spill]]  ;;  %p900_p13 = scmp.ge.s32.totalorder %s1138_s28, 2 }
 0x3a8   : > { %p1536_p4 = scmp.ne.s32.totalorder %s1524_s16, 0 }
 0x3aa   : > { %p896_p5 = pnand %p900_p13, %p1536_p4 }
 0x3ad   : > { %s756_s24 = sand.u32 1, %s1535_s11  }
 0x3ae   : > { %s757_s25 = scalar_lea.sflag [#allocation6], %s756_s24 }
 0x3af   : > { %1105 = dma.done.wait (!%p896_p5), %s757_s25, 256  }
 0x3b0   : > { %1107 = vsyncadd (!%p896_p5), %s757_s25, 4294967040  ;;  %s22_s28 = sadd.s32 1, %s1138_s28   ;;  %s1537_s13 = sld [smem:[#allocation11_spill]] }
 0x3b1   : > { %p19_p7 = scmp.ge.s32.totalorder %s22_s28, 6   ;;  %s1538_s19 = sld [smem:[#allocation12_spill]] }
 0x3b2   : > { %s1539_s21 = smov %s1114_s22  ;;  %s1540_s22 = smov %s1118_s23 }
 0x3b3   : > { %s1541_s23 = smov %s1265_s18  ;;  %s1542_s24 = smov %s1130_s26 }
 0x3b4   : > { %s1543_s25 = smov %s1134_s27  ;;  %21 = sbr.rel (!%p19_p7) target bundleno = 7 (0x7), region = 92 }
 0x3b6   : > { %s1544_s26 = smov %s1537_s13 }
 0x3b7   : > { %s1545_s27 = smov %s1538_s19 }
 0x3bb   :  { %762 = vsyncpa [#allocation5], 1 }
 0x3bc   :  { %764 = vsyncpa [#allocation5 + $0x1], 1 }
 0x3bd   :  { %765 = vsyncpa [#allocation6], 1 }
 0x3be   :  { %767 = vsyncpa [#allocation6 + $0x1], 1 }

</bundles_post_ra>
